<compile_context>
chip_gen: v5e
topology: v5e:2x2
jax: 0.10.0
libtpu: 0.0.40
codegen_flags: <defaults>
</compile_context>

<pallas_src>
import jax
import jax.numpy as jnp
from jax.experimental import pallas as pl
from jax.experimental.pallas import tpu as pltpu


def _make_block_kernel(n_head: int, head_size: int, n_embed: int, compute_dtype):
    eps = 1e-5

    def layernorm(v, gamma, beta):
        mu = jnp.mean(v, axis=-1, keepdims=True)
        var = jnp.mean((v - mu) ** 2, axis=-1, keepdims=True)
        return (v - mu) * jax.lax.rsqrt(var + eps) * gamma + beta

    def kernel(x_ref,
               ln1_g_ref, ln1_b_ref,
               wqkv_ref, wp_ref, bp_ref,
               ln2_g_ref, ln2_b_ref,
               w1_ref, b1_ref, w2_ref, b2_ref,
               o_ref):
        H, hs, C = n_head, head_size, n_embed
        x = x_ref[0]                                   # (T, C) f32
        T = x.shape[0]

        # ---- LayerNorm 1 (f32) + multi-head self-attention ----
        xn = layernorm(x, ln1_g_ref[...], ln1_b_ref[...]).astype(compute_dtype)

        # Fused per-head QKV projection: ONE batched matmul over the head axis.
        # wqkv_ref is (H, C, 3*hs), attention scale pre-folded into the Q columns.
        xn_b = jnp.broadcast_to(xn, (H, T, C))
        qkv = jnp.einsum('htc,hcd->htd', xn_b, wqkv_ref[...],
                         preferred_element_type=jnp.float32)      # (H, T, 3*hs)
        q = qkv[:, :, :hs].astype(compute_dtype)
        k = qkv[:, :, hs:2 * hs].astype(compute_dtype)
        v = qkv[:, :, 2 * hs:].astype(compute_dtype)

        # Batched-head attention (leading batch dim h); contracts last dims
        # directly (no explicit k.T). Softmax math in f32.
        s = jnp.einsum('hqd,hkd->hqk', q, k,
                       preferred_element_type=jnp.float32)        # (H, T, T)
        s = s - jnp.max(s, axis=-1, keepdims=True)
        e = jnp.exp(s)
        p = e * pl.reciprocal(jnp.sum(e, axis=-1, keepdims=True), approx=True)
        o = jnp.einsum('hqk,hkd->hqd', p.astype(compute_dtype), v,
                       preferred_element_type=jnp.float32)        # (H, T, hs)

        # Output projection per head, summed over heads == concat(heads) @ Wp.
        proj = jnp.einsum('htd,hdc->htc', o.astype(compute_dtype), wp_ref[...],
                          preferred_element_type=jnp.float32)     # (H, T, C)
        sa = jnp.sum(proj, axis=0) + bp_ref[...]                  # (T, C) f32
        x1 = x + sa                                               # residual 1

        # ---- LayerNorm 2 (f32) + FeedForward ----
        xn2 = layernorm(x1, ln2_g_ref[...], ln2_b_ref[...]).astype(compute_dtype)
        h = jnp.dot(xn2, w1_ref[...],
                    preferred_element_type=jnp.float32) + b1_ref[...]
        h = jnp.maximum(h, 0.0).astype(compute_dtype)             # ReLU
        ff = jnp.dot(h, w2_ref[...],
                     preferred_element_type=jnp.float32) + b2_ref[...]

        o_ref[0] = x1 + ff                                        # residual 2

    return kernel


def transformer_block(x, params, *, n_head, matmul_dtype=jnp.bfloat16):
    """x: (B, T, C) float32. params: dict of weights (see init_params)."""
    B, T, C = x.shape
    hs = C // n_head
    scale = float(C) ** -0.5   # NOTE: reference scales by n_embed**-0.5 (C), as in the PyTorch code.

    # ---- one-time weight re-arrangement (plain JAX, outside the kernel) ----
    def split_heads(w):        # (C, C) -> (H, C, hs)
        return w.reshape(C, n_head, hs).transpose(1, 0, 2)

    wqkv = jnp.concatenate(
        [split_heads(params["wq"]) * scale,          # fold attention scale into Q
         split_heads(params["wk"]),
         split_heads(params["wv"])],
        axis=-1).astype(matmul_dtype)                # (H, C, 3*hs)
    wp_h = params["wp"].reshape(n_head, hs, C).astype(matmul_dtype)   # (H, hs, C)
    w1 = params["w1"].astype(matmul_dtype)
    w2 = params["w2"].astype(matmul_dtype)

    kernel = _make_block_kernel(n_head, hs, C, matmul_dtype)

    def rep(shape):            # weight / bias blocks: full array, constant index map
        return pl.BlockSpec(shape, lambda b, _n=len(shape): (0,) * _n)

    in_specs = [
        pl.BlockSpec((1, T, C), lambda b: (b, 0, 0)),   # x: one batch element / step
        rep((1, C)), rep((1, C)),                       # ln1 gamma / beta
        rep((n_head, C, 3 * hs)),                       # fused per-head QKV weight
        rep((n_head, hs, C)),                           # per-head output projection
        rep((1, C)),                                    # proj bias
        rep((1, C)), rep((1, C)),                       # ln2 gamma / beta
        rep((C, 4 * C)), rep((1, 4 * C)),               # W1, b1
        rep((4 * C, C)), rep((1, C)),                   # W2, b2
    ]

    # Advisory cost estimate (QKV + scores + AV + proj + FFN).
    flops = int(2 * B * T * C * (12 * C + 2 * T))
    transcendentals = int(B * n_head * T * T + 4 * B * T)
    w_itemsize = jnp.dtype(matmul_dtype).itemsize
    param_bytes = int((wqkv.size + wp_h.size + w1.size + w2.size) * w_itemsize
                      + (6 * C + 4 * C) * 4)
    bytes_accessed = int(2 * B * T * C * 4 + param_bytes)

    # VMEM budget: resident (double-buffered) weights + x/out blocks + activations.
    # For large C raise the scoped limit (v6e/v5e); kept modest so it also fits
    # v7x's 64 MiB.  (Weights have constant index maps; single-buffering them via
    # pl.Buffered(1) would halve their footprint on VMEM-tight configs.)
    est_vmem = 2 * (param_bytes + 2 * T * C * 4) + 8 * T * 4 * C * 4
    vmem_limit = int(min(96 * 1024 * 1024, max(32 * 1024 * 1024, 2 * est_vmem)))

    return pl.pallas_call(
        kernel,
        out_shape=jax.ShapeDtypeStruct((B, T, C), jnp.float32),
        grid_spec=pltpu.PrefetchScalarGridSpec(
            num_scalar_prefetch=0,
            grid=(B,),
            in_specs=in_specs,
            out_specs=pl.BlockSpec((1, T, C), lambda b: (b, 0, 0)),
        ),
        compiler_params=pltpu.CompilerParams(
            dimension_semantics=("parallel",),
            vmem_limit_bytes=vmem_limit),
        cost_estimate=pl.CostEstimate(
            flops=flops,
            transcendentals=transcendentals,
            bytes_accessed=bytes_accessed),
    )(x,
      params["ln1_g"], params["ln1_b"],
      wqkv, wp_h, params["bp"],
      params["ln2_g"], params["ln2_b"],
      w1, params["b1"], w2, params["b2"])


def init_params(key, n_embed):
    ks = jax.random.split(key, 8)
    s = 0.02
    C = n_embed
    return {
        "ln1_g": jnp.ones((1, C), jnp.float32),
        "ln1_b": jnp.zeros((1, C), jnp.float32),
        # Linear weights stored as (in, out) so reference does x @ W
        "wq": jax.random.normal(ks[0], (C, C), jnp.float32) * s,
        "wk": jax.random.normal(ks[1], (C, C), jnp.float32) * s,
        "wv": jax.random.normal(ks[2], (C, C), jnp.float32) * s,
        "wp": jax.random.normal(ks[3], (C, C), jnp.float32) * s,
        "bp": jax.random.normal(ks[4], (1, C), jnp.float32) * s,
        "ln2_g": jnp.ones((1, C), jnp.float32),
        "ln2_b": jnp.zeros((1, C), jnp.float32),
        "w1": jax.random.normal(ks[5], (C, 4 * C), jnp.float32) * s,
        "b1": jnp.zeros((1, 4 * C), jnp.float32),
        "w2": jax.random.normal(ks[6], (4 * C, C), jnp.float32) * s,
        "b2": jnp.zeros((1, C), jnp.float32),
    }


def _reference_block(x, p, n_head):
    """Pure-JAX reference matching the PyTorch module (eval mode)."""
    B, T, C = x.shape
    hs = C // n_head

    def ln(v, g, b):
        mu = v.mean(-1, keepdims=True)
        var = ((v - mu) ** 2).mean(-1, keepdims=True)
        return (v - mu) / jnp.sqrt(var + 1e-5) * g + b

    xn = ln(x, p["ln1_g"], p["ln1_b"])
    q = xn @ p["wq"]; k = xn @ p["wk"]; v = xn @ p["wv"]
    outs = []
    for h in range(n_head):
        sl = slice(h * hs, (h + 1) * hs)
        wei = (q[..., sl] @ jnp.swapaxes(k[..., sl], -1, -2)) * (C ** -0.5)
        wei = jax.nn.softmax(wei, axis=-1)
        outs.append(wei @ v[..., sl])
    sa = jnp.concatenate(outs, -1) @ p["wp"] + p["bp"]
    x1 = x + sa
    xn2 = ln(x1, p["ln2_g"], p["ln2_b"])
    ff = jnp.maximum(xn2 @ p["w1"] + p["b1"], 0.0) @ p["w2"] + p["b2"]
    return x1 + ff


if __name__ == "__main__":
    B, T, n_embed, n_head = 2, 8, 32, 4
    key = jax.random.PRNGKey(0)
    kx, kp = jax.random.split(key)
    x = jax.random.normal(kx, (B, T, n_embed), jnp.float32)
    params = init_params(kp, n_embed)

    ref = _reference_block(x, params, n_head)

    # f32 matmul path: checks forward semantics closely.
    out_f32 = jax.block_until_ready(
        transformer_block(x, params, n_head=n_head, matmul_dtype=jnp.float32))
    assert out_f32.shape == (B, T, n_embed)
    assert jnp.allclose(out_f32, ref, atol=5e-3, rtol=5e-3), "f32 mismatch vs JAX reference"

    # bf16 matmul path (default, per perf guidance): looser tolerance.
    out_bf16 = jax.block_until_ready(
        transformer_block(x, params, n_head=n_head, matmul_dtype=jnp.bfloat16))
    assert out_bf16.shape == (B, T, n_embed)
    assert jnp.allclose(out_bf16, ref, atol=7.5e-2, rtol=7.5e-2), "bf16 mismatch vs JAX reference"

    print("KERNEL_OK")
</pallas_src>

<mosaic_0001>
module attributes {stable_mosaic.version = 11 : i64} {
  func.func @kernel(%arg0: i32, %arg1: memref<1x8x32xf32, #tpu.memory_space<vmem>>, %arg2: memref<1x32xf32, #tpu.memory_space<vmem>>, %arg3: memref<1x32xf32, #tpu.memory_space<vmem>>, %arg4: memref<4x32x24xf32, #tpu.memory_space<vmem>>, %arg5: memref<4x8x32xf32, #tpu.memory_space<vmem>>, %arg6: memref<1x32xf32, #tpu.memory_space<vmem>>, %arg7: memref<1x32xf32, #tpu.memory_space<vmem>>, %arg8: memref<1x32xf32, #tpu.memory_space<vmem>>, %arg9: memref<32x128xf32, #tpu.memory_space<vmem>>, %arg10: memref<1x128xf32, #tpu.memory_space<vmem>>, %arg11: memref<128x32xf32, #tpu.memory_space<vmem>>, %arg12: memref<1x32xf32, #tpu.memory_space<vmem>>, %arg13: memref<1x8x32xf32, #tpu.memory_space<vmem>>) attributes {dimension_semantics = [#tpu.dimension_semantics<parallel>], iteration_bounds = array<i64: 2>, scalar_prefetch = 0 : i64, scratch_operands = 0 : i64, tpu.core_type = #tpu.core_type<tc>, window_params = [{transform_indices = @transform_0, window_bounds = array<i64: 1, 8, 32>}, {pipeline_mode = #tpu.pipeline_mode<synchronous>, transform_indices = @transform_1, window_bounds = array<i64: 1, 32>}, {pipeline_mode = #tpu.pipeline_mode<synchronous>, transform_indices = @transform_2, window_bounds = array<i64: 1, 32>}, {pipeline_mode = #tpu.pipeline_mode<synchronous>, transform_indices = @transform_3, window_bounds = array<i64: 4, 32, 24>}, {pipeline_mode = #tpu.pipeline_mode<synchronous>, transform_indices = @transform_4, window_bounds = array<i64: 4, 8, 32>}, {pipeline_mode = #tpu.pipeline_mode<synchronous>, transform_indices = @transform_5, window_bounds = array<i64: 1, 32>}, {pipeline_mode = #tpu.pipeline_mode<synchronous>, transform_indices = @transform_6, window_bounds = array<i64: 1, 32>}, {pipeline_mode = #tpu.pipeline_mode<synchronous>, transform_indices = @transform_7, window_bounds = array<i64: 1, 32>}, {pipeline_mode = #tpu.pipeline_mode<synchronous>, transform_indices = @transform_8, window_bounds = array<i64: 32, 128>}, {pipeline_mode = #tpu.pipeline_mode<synchronous>, transform_indices = @transform_9, window_bounds = array<i64: 1, 128>}, {pipeline_mode = #tpu.pipeline_mode<synchronous>, transform_indices = @transform_10, window_bounds = array<i64: 128, 32>}, {pipeline_mode = #tpu.pipeline_mode<synchronous>, transform_indices = @transform_11, window_bounds = array<i64: 1, 32>}, {transform_indices = @transform_12, window_bounds = array<i64: 1, 8, 32>}]} {
    %c0 = arith.constant 0 : index
    %c0_0 = arith.constant 0 : index
    %c0_1 = arith.constant 0 : index
    %0 = vector.load %arg1[%c0, %c0_0, %c0_1] : memref<1x8x32xf32, #tpu.memory_space<vmem>>, vector<1x8x32xf32>
    %1 = vector.shape_cast %0 : vector<1x8x32xf32> to vector<8x32xf32>
    %c0_2 = arith.constant 0 : index
    %c0_3 = arith.constant 0 : index
    %2 = vector.load %arg2[%c0_2, %c0_3] : memref<1x32xf32, #tpu.memory_space<vmem>>, vector<1x32xf32>
    %c0_4 = arith.constant 0 : index
    %c0_5 = arith.constant 0 : index
    %3 = vector.load %arg3[%c0_4, %c0_5] : memref<1x32xf32, #tpu.memory_space<vmem>>, vector<1x32xf32>
    %cst = arith.constant dense<0.000000e+00> : vector<8xf32>
    %4 = vector.multi_reduction <add>, %1, %cst [1] : vector<8x32xf32> to vector<8xf32>
    %5 = vector.shape_cast %4 : vector<8xf32> to vector<8x1xf32>
    %cst_6 = arith.constant 3.200000e+01 : f32
    %6 = vector.broadcast %cst_6 : f32 to vector<8x1xf32>
    %7 = arith.divf %5, %6 : vector<8x1xf32>
    %8 = vector.broadcast %7 : vector<8x1xf32> to vector<8x32xf32>
    %9 = arith.subf %1, %8 : vector<8x32xf32>
    %10 = arith.mulf %9, %9 : vector<8x32xf32>
    %cst_7 = arith.constant dense<0.000000e+00> : vector<8xf32>
    %11 = vector.multi_reduction <add>, %10, %cst_7 [1] : vector<8x32xf32> to vector<8xf32>
    %12 = vector.shape_cast %11 : vector<8xf32> to vector<8x1xf32>
    %cst_8 = arith.constant 3.200000e+01 : f32
    %13 = vector.broadcast %cst_8 : f32 to vector<8x1xf32>
    %14 = arith.divf %12, %13 : vector<8x1xf32>
    %15 = vector.broadcast %7 : vector<8x1xf32> to vector<8x32xf32>
    %16 = arith.subf %1, %15 : vector<8x32xf32>
    %cst_9 = arith.constant 9.99999974E-6 : f32
    %17 = vector.broadcast %cst_9 : f32 to vector<8x1xf32>
    %18 = arith.addf %14, %17 : vector<8x1xf32>
    %19 = math.rsqrt %18 : vector<8x1xf32>
    %20 = vector.broadcast %19 : vector<8x1xf32> to vector<8x32xf32>
    %21 = arith.mulf %16, %20 : vector<8x32xf32>
    %22 = vector.broadcast %2 : vector<1x32xf32> to vector<8x32xf32>
    %23 = arith.mulf %21, %22 : vector<8x32xf32>
    %24 = vector.broadcast %3 : vector<1x32xf32> to vector<8x32xf32>
    %25 = arith.addf %23, %24 : vector<8x32xf32>
    %26 = vector.shape_cast %25 : vector<8x32xf32> to vector<1x8x32xf32>
    %27 = vector.broadcast %26 : vector<1x8x32xf32> to vector<4x8x32xf32>
    %c0_10 = arith.constant 0 : index
    %c0_11 = arith.constant 0 : index
    %c0_12 = arith.constant 0 : index
    %28 = vector.load %arg4[%c0_10, %c0_11, %c0_12] : memref<4x32x24xf32, #tpu.memory_space<vmem>>, vector<4x32x24xf32>
    "tpu.trace_start"() <{level = 10 : i32, message = "htc,hcd->htd"}> : () -> ()
    %cst_13 = arith.constant dense<0.000000e+00> : vector<4x8x24xf32>
    %29 = tpu.matmul %27, %28, %cst_13 {dimension_numbers = #tpu.dot_dimension_numbers<[2], [1], [1], [2], [0, 0, 0, 1, 1, 2], [0], [0]>} : vector<4x8x32xf32>, vector<4x32x24xf32>, vector<4x8x24xf32> -> vector<4x8x24xf32>
    "tpu.trace_stop"() : () -> ()
    %30 = vector.extract_strided_slice %29 {offsets = [0, 0, 0], sizes = [4, 8, 8], strides = [1, 1, 1]} : vector<4x8x24xf32> to vector<4x8x8xf32>
    %31 = vector.extract_strided_slice %29 {offsets = [0, 0, 8], sizes = [4, 8, 8], strides = [1, 1, 1]} : vector<4x8x24xf32> to vector<4x8x8xf32>
    %32 = vector.extract_strided_slice %29 {offsets = [0, 0, 16], sizes = [4, 8, 8], strides = [1, 1, 1]} : vector<4x8x24xf32> to vector<4x8x8xf32>
    "tpu.trace_start"() <{level = 10 : i32, message = "hqd,hkd->hqk"}> : () -> ()
    %cst_14 = arith.constant dense<0.000000e+00> : vector<4x8x8xf32>
    %33 = tpu.matmul %30, %31, %cst_14 {dimension_numbers = #tpu.dot_dimension_numbers<[2], [2], [1], [1], [0, 0, 0, 1, 1, 1], [0], [0]>} : vector<4x8x8xf32>, vector<4x8x8xf32>, vector<4x8x8xf32> -> vector<4x8x8xf32>
    "tpu.trace_stop"() : () -> ()
    %cst_15 = arith.constant dense<0xFF800000> : vector<4x8xf32>
    %34 = vector.multi_reduction <maximumf>, %33, %cst_15 [2] : vector<4x8x8xf32> to vector<4x8xf32>
    %35 = vector.shape_cast %34 : vector<4x8xf32> to vector<4x8x1xf32>
    %36 = vector.broadcast %35 : vector<4x8x1xf32> to vector<4x8x8xf32>
    %37 = arith.subf %33, %36 : vector<4x8x8xf32>
    %38 = math.exp %37 : vector<4x8x8xf32>
    %cst_16 = arith.constant dense<0.000000e+00> : vector<4x8xf32>
    %39 = vector.multi_reduction <add>, %38, %cst_16 [2] : vector<4x8x8xf32> to vector<4x8xf32>
    %40 = vector.shape_cast %39 : vector<4x8xf32> to vector<4x8x1xf32>
    %41 = tpu.reciprocal %40 {approx = true} : vector<4x8x1xf32> -> vector<4x8x1xf32>
    %42 = vector.broadcast %41 : vector<4x8x1xf32> to vector<4x8x8xf32>
    %43 = arith.mulf %38, %42 : vector<4x8x8xf32>
    "tpu.trace_start"() <{level = 10 : i32, message = "hqk,hkd->hqd"}> : () -> ()
    %cst_17 = arith.constant dense<0.000000e+00> : vector<4x8x8xf32>
    %44 = tpu.matmul %43, %32, %cst_17 {dimension_numbers = #tpu.dot_dimension_numbers<[2], [1], [1], [2], [0, 0, 0, 1, 1, 2], [0], [0]>} : vector<4x8x8xf32>, vector<4x8x8xf32>, vector<4x8x8xf32> -> vector<4x8x8xf32>
    "tpu.trace_stop"() : () -> ()
    %c0_18 = arith.constant 0 : index
    %c0_19 = arith.constant 0 : index
    %c0_20 = arith.constant 0 : index
    %45 = vector.load %arg5[%c0_18, %c0_19, %c0_20] : memref<4x8x32xf32, #tpu.memory_space<vmem>>, vector<4x8x32xf32>
    "tpu.trace_start"() <{level = 10 : i32, message = "htd,hdc->htc"}> : () -> ()
    %cst_21 = arith.constant dense<0.000000e+00> : vector<4x8x32xf32>
    %46 = tpu.matmul %44, %45, %cst_21 {dimension_numbers = #tpu.dot_dimension_numbers<[2], [1], [1], [2], [0, 0, 0, 1, 1, 2], [0], [0]>} : vector<4x8x8xf32>, vector<4x8x32xf32>, vector<4x8x32xf32> -> vector<4x8x32xf32>
    "tpu.trace_stop"() : () -> ()
    %cst_22 = arith.constant dense<0.000000e+00> : vector<8x32xf32>
    %47 = vector.multi_reduction <add>, %46, %cst_22 [0] : vector<4x8x32xf32> to vector<8x32xf32>
    %c0_23 = arith.constant 0 : index
    %c0_24 = arith.constant 0 : index
    %48 = vector.load %arg6[%c0_23, %c0_24] : memref<1x32xf32, #tpu.memory_space<vmem>>, vector<1x32xf32>
    %49 = vector.broadcast %48 : vector<1x32xf32> to vector<8x32xf32>
    %50 = arith.addf %47, %49 : vector<8x32xf32>
    %51 = arith.addf %1, %50 : vector<8x32xf32>
    %c0_25 = arith.constant 0 : index
    %c0_26 = arith.constant 0 : index
    %52 = vector.load %arg7[%c0_25, %c0_26] : memref<1x32xf32, #tpu.memory_space<vmem>>, vector<1x32xf32>
    %c0_27 = arith.constant 0 : index
    %c0_28 = arith.constant 0 : index
    %53 = vector.load %arg8[%c0_27, %c0_28] : memref<1x32xf32, #tpu.memory_space<vmem>>, vector<1x32xf32>
    %cst_29 = arith.constant dense<0.000000e+00> : vector<8xf32>
    %54 = vector.multi_reduction <add>, %51, %cst_29 [1] : vector<8x32xf32> to vector<8xf32>
    %55 = vector.shape_cast %54 : vector<8xf32> to vector<8x1xf32>
    %cst_30 = arith.constant 3.200000e+01 : f32
    %56 = vector.broadcast %cst_30 : f32 to vector<8x1xf32>
    %57 = arith.divf %55, %56 : vector<8x1xf32>
    %58 = vector.broadcast %57 : vector<8x1xf32> to vector<8x32xf32>
    %59 = arith.subf %51, %58 : vector<8x32xf32>
    %60 = arith.mulf %59, %59 : vector<8x32xf32>
    %cst_31 = arith.constant dense<0.000000e+00> : vector<8xf32>
    %61 = vector.multi_reduction <add>, %60, %cst_31 [1] : vector<8x32xf32> to vector<8xf32>
    %62 = vector.shape_cast %61 : vector<8xf32> to vector<8x1xf32>
    %cst_32 = arith.constant 3.200000e+01 : f32
    %63 = vector.broadcast %cst_32 : f32 to vector<8x1xf32>
    %64 = arith.divf %62, %63 : vector<8x1xf32>
    %65 = vector.broadcast %57 : vector<8x1xf32> to vector<8x32xf32>
    %66 = arith.subf %51, %65 : vector<8x32xf32>
    %cst_33 = arith.constant 9.99999974E-6 : f32
    %67 = vector.broadcast %cst_33 : f32 to vector<8x1xf32>
    %68 = arith.addf %64, %67 : vector<8x1xf32>
    %69 = math.rsqrt %68 : vector<8x1xf32>
    %70 = vector.broadcast %69 : vector<8x1xf32> to vector<8x32xf32>
    %71 = arith.mulf %66, %70 : vector<8x32xf32>
    %72 = vector.broadcast %52 : vector<1x32xf32> to vector<8x32xf32>
    %73 = arith.mulf %71, %72 : vector<8x32xf32>
    %74 = vector.broadcast %53 : vector<1x32xf32> to vector<8x32xf32>
    %75 = arith.addf %73, %74 : vector<8x32xf32>
    %c0_34 = arith.constant 0 : index
    %c0_35 = arith.constant 0 : index
    %76 = vector.load %arg9[%c0_34, %c0_35] : memref<32x128xf32, #tpu.memory_space<vmem>>, vector<32x128xf32>
    %cst_36 = arith.constant dense<0.000000e+00> : vector<8x128xf32>
    %77 = tpu.matmul %75, %76, %cst_36 {dimension_numbers = #tpu.dot_dimension_numbers<[1], [0], [0], [1], [0, 0, 1, 1], [], []>} : vector<8x32xf32>, vector<32x128xf32>, vector<8x128xf32> -> vector<8x128xf32>
    %c0_37 = arith.constant 0 : index
    %c0_38 = arith.constant 0 : index
    %78 = vector.load %arg10[%c0_37, %c0_38] : memref<1x128xf32, #tpu.memory_space<vmem>>, vector<1x128xf32>
    %79 = vector.broadcast %78 : vector<1x128xf32> to vector<8x128xf32>
    %80 = arith.addf %77, %79 : vector<8x128xf32>
    %cst_39 = arith.constant 0.000000e+00 : f32
    %81 = vector.broadcast %cst_39 : f32 to vector<8x128xf32>
    %82 = arith.maximumf %80, %81 : vector<8x128xf32>
    %c0_40 = arith.constant 0 : index
    %c0_41 = arith.constant 0 : index
    %83 = vector.load %arg11[%c0_40, %c0_41] : memref<128x32xf32, #tpu.memory_space<vmem>>, vector<128x32xf32>
    %cst_42 = arith.constant dense<0.000000e+00> : vector<8x32xf32>
    %84 = tpu.matmul %82, %83, %cst_42 {dimension_numbers = #tpu.dot_dimension_numbers<[1], [0], [0], [1], [0, 0, 1, 1], [], []>} : vector<8x128xf32>, vector<128x32xf32>, vector<8x32xf32> -> vector<8x32xf32>
    %c0_43 = arith.constant 0 : index
    %c0_44 = arith.constant 0 : index
    %85 = vector.load %arg12[%c0_43, %c0_44] : memref<1x32xf32, #tpu.memory_space<vmem>>, vector<1x32xf32>
    %86 = vector.broadcast %85 : vector<1x32xf32> to vector<8x32xf32>
    %87 = arith.addf %84, %86 : vector<8x32xf32>
    %88 = arith.addf %51, %87 : vector<8x32xf32>
    %c0_45 = arith.constant 0 : index
    %c0_46 = arith.constant 0 : index
    %c0_47 = arith.constant 0 : index
    %89 = vector.load %arg13[%c0_45, %c0_46, %c0_47] : memref<1x8x32xf32, #tpu.memory_space<vmem>>, vector<1x8x32xf32>
    %90 = vector.shape_cast %89 : vector<1x8x32xf32> to vector<8x32xf32>
    %91 = vector.shape_cast %88 : vector<8x32xf32> to vector<1x8x32xf32>
    tpu.vector_store %arg13[%c0_45, %c0_46, %c0_47], %91 {strides = array<i32>} : memref<1x8x32xf32, #tpu.memory_space<vmem>>, vector<1x8x32xf32>,
    return
  }
  func.func @transform_0(%arg0: i32) -> (i32, i32, i32) {
    %c0_i32 = arith.constant 0 : i32
    %c0_i32_0 = arith.constant 0 : i32
    %c0_i32_1 = arith.constant 0 : i32
    return %arg0, %c0_i32, %c0_i32_0 : i32, i32, i32
  }
  func.func @transform_1(%arg0: i32) -> (i32, i32) {
    %c0_i32 = arith.constant 0 : i32
    %c0_i32_0 = arith.constant 0 : i32
    %c0_i32_1 = arith.constant 0 : i32
    return %c0_i32, %c0_i32_0 : i32, i32
  }
  func.func @transform_2(%arg0: i32) -> (i32, i32) {
    %c0_i32 = arith.constant 0 : i32
    %c0_i32_0 = arith.constant 0 : i32
    %c0_i32_1 = arith.constant 0 : i32
    return %c0_i32, %c0_i32_0 : i32, i32
  }
  func.func @transform_3(%arg0: i32) -> (i32, i32, i32) {
    %c0_i32 = arith.constant 0 : i32
    %c0_i32_0 = arith.constant 0 : i32
    %c0_i32_1 = arith.constant 0 : i32
    %c0_i32_2 = arith.constant 0 : i32
    return %c0_i32, %c0_i32_0, %c0_i32_1 : i32, i32, i32
  }
  func.func @transform_4(%arg0: i32) -> (i32, i32, i32) {
    %c0_i32 = arith.constant 0 : i32
    %c0_i32_0 = arith.constant 0 : i32
    %c0_i32_1 = arith.constant 0 : i32
    %c0_i32_2 = arith.constant 0 : i32
    return %c0_i32, %c0_i32_0, %c0_i32_1 : i32, i32, i32
  }
  func.func @transform_5(%arg0: i32) -> (i32, i32) {
    %c0_i32 = arith.constant 0 : i32
    %c0_i32_0 = arith.constant 0 : i32
    %c0_i32_1 = arith.constant 0 : i32
    return %c0_i32, %c0_i32_0 : i32, i32
  }
  func.func @transform_6(%arg0: i32) -> (i32, i32) {
    %c0_i32 = arith.constant 0 : i32
    %c0_i32_0 = arith.constant 0 : i32
    %c0_i32_1 = arith.constant 0 : i32
    return %c0_i32, %c0_i32_0 : i32, i32
  }
  func.func @transform_7(%arg0: i32) -> (i32, i32) {
    %c0_i32 = arith.constant 0 : i32
    %c0_i32_0 = arith.constant 0 : i32
    %c0_i32_1 = arith.constant 0 : i32
    return %c0_i32, %c0_i32_0 : i32, i32
  }
  func.func @transform_8(%arg0: i32) -> (i32, i32) {
    %c0_i32 = arith.constant 0 : i32
    %c0_i32_0 = arith.constant 0 : i32
    %c0_i32_1 = arith.constant 0 : i32
    return %c0_i32, %c0_i32_0 : i32, i32
  }
  func.func @transform_9(%arg0: i32) -> (i32, i32) {
    %c0_i32 = arith.constant 0 : i32
    %c0_i32_0 = arith.constant 0 : i32
    %c0_i32_1 = arith.constant 0 : i32
    return %c0_i32, %c0_i32_0 : i32, i32
  }
  func.func @transform_10(%arg0: i32) -> (i32, i32) {
    %c0_i32 = arith.constant 0 : i32
    %c0_i32_0 = arith.constant 0 : i32
    %c0_i32_1 = arith.constant 0 : i32
    return %c0_i32, %c0_i32_0 : i32, i32
  }
  func.func @transform_11(%arg0: i32) -> (i32, i32) {
    %c0_i32 = arith.constant 0 : i32
    %c0_i32_0 = arith.constant 0 : i32
    %c0_i32_1 = arith.constant 0 : i32
    return %c0_i32, %c0_i32_0 : i32, i32
  }
  func.func @transform_12(%arg0: i32) -> (i32, i32, i32) {
    %c0_i32 = arith.constant 0 : i32
    %c0_i32_0 = arith.constant 0 : i32
    %c0_i32_1 = arith.constant 0 : i32
    return %arg0, %c0_i32, %c0_i32_0 : i32, i32, i32
  }
}

</mosaic_0001>

<bundles_post_ra>
// kernel: tpu_custom_call.1
= control target key start
LH: loop header
LB: loop body
LE: loop exit
PB: predicated region body
PF: predicated region fallthrough
CT: control target
= control target key end

     0   :  { %s1625_s0 = inlined_call_operand.vmem [shape: f32[2,8,32], index: 0, kind: input, shape index: {}]   ;;  %s1626_s1 = inlined_call_operand.vmem [shape: f32[1,32], index: 1, kind: input, shape index: {}]   ;;  %s1627_s2 = inlined_call_operand.vmem [shape: f32[1,32], index: 2, kind: input, shape index: {}]   ;;  %s1628_s3 = inlined_call_operand.vmem [shape: f32[4,32,24], index: 3, kind: input, shape index: {}]   ;;  %s1629_s4 = inlined_call_operand.vmem [shape: f32[4,8,32], index: 4, kind: input, shape index: {}]   ;;  %s1630_s5 = inlined_call_operand.vmem [shape: f32[1,32], index: 5, kind: input, shape index: {}]   ;;  %s1631_s6 = inlined_call_operand.vmem [shape: f32[1,32], index: 6, kind: input, shape index: {}]   ;;  %s1632_s7 = inlined_call_operand.vmem [shape: f32[1,32], index: 7, kind: input, shape index: {}]   ;;  %s1633_s8 = inlined_call_operand.vmem [shape: f32[32,128], index: 8, kind: input, shape index: {}]   ;;  %s1634_s9 = inlined_call_operand.vmem [shape: f32[1,128], index: 9, kind: input, shape index: {}]   ;;  %s1635_s10 = inlined_call_operand.vmem [shape: f32[128,32], index: 10, kind: input, shape index: {}]   ;;  %s1636_s11 = inlined_call_operand.vmem [shape: f32[1,32], index: 11, kind: input, shape index: {}]   ;;  %s1637_s12 = inlined_call_operand.hbm [shape: f32[2,8,32], index: 12, kind: output, shape index: {}]  }
   0x1   :  { %1638 = sst [smem:[#allocation5_spill]] %s1625_s0 }
   0x2   :  { %1639 = sst [smem:[#allocation6_spill]] %s1626_s1 }
   0x3   :  { %1640 = sst [smem:[#allocation7_spill]] %s1627_s2 }
   0x4   :  { %17 = vsyncpa [#allocation3], 0 }
   0x5   :  { %19 = vsyncpa [#allocation3 + $0x1], 0  ;;  %s1340_s21 = smov 0   ;;  %s1342_s22 = smov 0  }
   0x6   :  { %s1344_s23 = smov 0   ;;  %s1346_s24 = smov 0  }
   0x7 LB: > { %s1361_s25 = sadd.s32 4294967295, %s1270_s24   ;;  %s1096_s26 = sadd.s32 4294967294, %s1270_s24   ;;  %s1270_s24 = sphi %s1346_s24, %s1649_s24   ;;  %s1266_s23 = sphi %s1344_s23, %s1648_s23   ;;  %s1262_s22 = sphi %s1342_s22, %s1647_s22   ;;  %s1258_s21 = sphi %s1340_s21, %s1646_s21  }
   0x8   : > { %s1365_s27 = sadd.s32 1, %s1270_s24   ;;  %s289_s28 = sadd.s32 1, %s1266_s23 }
   0x9   : > { %s286_s29 = ssub.s32 %s1270_s24, %s1365_s27  ;;  %p299_p0 = scmp.ne.s32.totalorder %s1266_s23, %s1262_s22 }
   0xa   : > { %p287_p1 = scmp.eq.s32.totalorder %s286_s29, 0  ;;  %p300_p2 = scmp.eq.s32.totalorder %s1361_s25, 1 }
   0xb   : > { %p305_p3 = scmp.ne.s32.totalorder %s1262_s22, %s1258_s21  ;;  %p306_p4 = scmp.eq.s32.totalorder %s1096_s26, 1 }
   0xc   : > { %s1376_s30 = scalar_select %p287_p1, %s1266_s23, %s289_s28  }
   0xd   : > { %p1378_p5 = por %p300_p2, %p299_p0  ;;  %p1382_p6 = por %p306_p4, %p305_p3 }
   0xe   : > { %p1099_p7 = scmp.ge.s32.totalorder %s1270_s24, 1  ;;  %p364_p8 = scmp.lt.s32.totalorder %s1270_s24, 3 }
  0x10   : > { %p365_p9 = pnand %p1099_p7, %p364_p8 }
  0x11   : > { %p405_p10 = scmp.lt.s32.totalorder (!%p365_p9), %s1361_s25, 1  ;;  %s1643_s0 = sld [smem:[#allocation5_spill]] (!%p365_p9) }
  0x12   : > { %368 = sbr.rel (%p365_p9) target bundleno = 1765 (0x6e5), region = 68  ;;  %s1644_s1 = sld [smem:[#allocation6_spill]] (!%p365_p9) }
  0x13   : > { %s1645_s2 = sld [smem:[#allocation7_spill]] (!%p365_p9)  ;;  %s1273_s17 = smov (!%p365_p9), 120  }
  0x14   : > { %s1274_s18 = smov (!%p365_p9), 112  }
  0x17   : > { %s406_s15 = scalar_select %p405_p10, %s1361_s25, 1  ;;  %vm412_vm0 = vcmask 261120   ;;  %v1272_v2 = vmov 32.0   ;;  %v453_v14 = vld [vmem:[%s1628_s3 + $0x18] sm:$0xff]  ;;  %v452_v17 = vld [vmem:[%s1628_s3 + $0x10] sm:$0xff]  ;;  %v451_v20 = vld [vmem:[%s1628_s3 + $0x8] sm:$0xff] }
  0x18   : > { %1186 = vrcp.f32 %v1272_v2  ;;  %v457_v15 = vld [vmem:[%s1628_s3 + $0x38] sm:$0xff]  ;;  %481 = vmatpush.msra.mxu0 %v453_v14  ;;  %v456_v18 = vld [vmem:[%s1628_s3 + $0x30] sm:$0xff]  ;;  %v455_v21 = vld [vmem:[%s1628_s3 + $0x28] sm:$0xff]  ;;  %vm552_vm5 = vcmask 64512  }
  0x19   : > { %s1101_s16 = sshll.u32 %s406_s15, 3  ;;  %v465_v16 = vld [vmem:[%s1628_s3 + $0x78] sm:$0xff]  ;;  %501 = vmatpush.msra.mxu2 %v457_v15  ;;  %v464_v19 = vld [vmem:[%s1628_s3 + $0x70] sm:$0xff]  ;;  %v463_v22 = vld [vmem:[%s1628_s3 + $0x68] sm:$0xff]  ;;  %s402_s15 = sand.u32 1, %s1262_s22  }
  0x1a   : > { %s408_s19 = scalar_lea.vmem %s1643_s0, %s1101_s16  ;;  %541 = vmatpush.msra.mxu3 %v465_v16  ;;  %482 = vmatpush.msra.mxu0 %v452_v17  ;;  %v450_v23 = vld [vmem:[%s1628_s3] sm:$0xff]  ;;  %v461_v26 = vld [vmem:[%s1628_s3 + $0x58] sm:$0xff]  ;;  %v460_v27 = vld [vmem:[%s1628_s3 + $0x50] sm:$0xff]  ;;  %s1100_s16 = sshll.u32 %s402_s15, 3 }
  0x1b   : > { %v1393_v0 = vld [vmem:[%s408_s19] sm:$0xff]  ;;  %502 = vmatpush.msra.mxu2 %v456_v18  ;;  %v459_v29 = vld [vmem:[%s1628_s3 + $0x48] sm:$0xff]  ;;  %s404_s26 = scalar_lea.vmem [#allocation2], %s1100_s16  ;;  %s1228_s16 = scalar_lea.hbm %s1637_s12, 16 }
  0x1c   : > { %v413_v1 = vsel %vm412_vm0, %v1393_v0, 0.0  ;;  %542 = vmatpush.msra.mxu3 %v464_v19  ;;  %v454_v24 = vld [vmem:[%s1628_s3 + $0x20] sm:$0xff]  ;;  %483 = vmatpush.msra.mxu0 %v451_v20  ;;  %s1034_s28 = sshll.u32 %s404_s26, 4  ;;  %s1035_s28 = int_to_ptr.vmem [resolvable:$true] %s1034_s28 }
  0x1d   : > { %414 = vadd.xlane.f32.xlu0 %v413_v1  ;;  %503 = vmatpush.msra.mxu2 %v455_v21  ;;  %v462_v25 = vld [vmem:[%s1628_s3 + $0x60] sm:$0xff] }
  0x1e   : > { %v1187_v3 = vpop.eup %1186  ;;  %543 = vmatpush.msra.mxu3 %v463_v22  ;;  %484 = vmatpush.msra.mxu0 %v450_v23  ;;  %v458_v31 = vld [vmem:[%s1628_s3 + $0x40] sm:$0xff] }
  0x1f   : > { %v417_v4 = vmul.f32 32.0, %v1187_v3  ;;  %vm421_vm1 = vweird.f32 %v1187_v3  ;;  %504 = vmatpush.msra.mxu2 %v454_v24  ;;  %v1179_v39 = vld [vmem:[%s1644_s1] ss:$0 sm:$0xff] }
  0x20   : > { %544 = vmatpush.msra.mxu3 %v462_v25  ;;  %v1180_v42 = vld [vmem:[%s1645_s2] ss:$0 sm:$0xff] }
  0x21   : > { %v418_v5 = vsub.f32 1.0, %v417_v4  ;;  %521 = vmatpush.msrb.mxu2 %v461_v26 }
  0x23   : > { %v419_v6 = vmul.f32 %v1187_v3, %v418_v5  ;;  %522 = vmatpush.msrb.mxu2 %v460_v27 }
  0x25   : > { %v420_v7 = vadd.f32 %v1187_v3, %v419_v6  ;;  %523 = vmatpush.msrb.mxu2 %v459_v29 }
  0x27   : > { %v1397_v8 = vsel %vm421_vm1, %v1187_v3, %v420_v7  ;;  %524 = vmatpush.msrb.mxu2 %v458_v31 }
  0x90   : > { %v415_v9 = vpop.xlane.xlu0 %414 }
  0x91   : > { %v423_v10 = vmul.f32 %v1397_v8, %v415_v9 }
  0x93   : > { %v424_v11 = vsub.f32 %v1393_v0, %v423_v10 }
  0x95   : > { %v425_v12 = vmul.f32 %v424_v11, %v424_v11 }
  0x97   : > { %v426_v13 = vsel %vm412_vm0, %v425_v12, 0.0 }
  0x98   : > { %427 = vadd.xlane.f32.xlu0 %v426_v13 }
 0x10b   : > { %v428_v28 = vpop.xlane.xlu0 %427 }
 0x10c   : > { %v429_v30 = vmul.f32 %v428_v28, %v1397_v8 }
 0x10e   : > { %v430_v32 = vadd.f32 1e-05, %v429_v30 }
 0x110   : > { %1188 = vrsqrt.f32 %v430_v32  ;;  %vm437_vm3 = vweird.f32 %v430_v32 }
 0x116   : > { %v1189_v33 = vpop.eup %1188 }
 0x117   : > { %v432_v34 = vmul.f32 %v1189_v33, %v430_v32  ;;  %vm438_vm2 = vweird.f32 %v1189_v33 }
 0x118   : > { %vm439_vm4 = vmor %vm437_vm3, %vm438_vm2 }
 0x119   : > { %v433_v35 = vmul.f32 %v1189_v33, %v432_v34 }
 0x11b   : > { %v434_v36 = vmul.f32 0.5, %v433_v35 }
 0x11d   : > { %v435_v37 = vsub.f32 1.5, %v434_v36 }
 0x11f   : > { %v436_v38 = vmul.f32 %v1189_v33, %v435_v37 }
 0x121   : > { %v440_v40 = vsel %vm439_vm4, %v1189_v33, %v436_v38 }
 0x122   : > { %v441_v41 = vmul.f32 %v440_v40, %v424_v11 }
 0x124   : > { %v445_v43 = vmul.f32 %v1179_v39, %v441_v41  ;;  %v806_v39 = vld [vmem:[%s1629_s4] sm:$0xff]  ;;  %v807_v41 = vld [vmem:[%s1629_s4 + $0x8] sm:$0xff] }
 0x126   : > { %v449_v44 = vadd.f32 %v1180_v42, %v445_v43  ;;  %v808_v42 = vld [vmem:[%s1629_s4 + $0x10] sm:$0xff]  ;;  %v809_v43 = vld [vmem:[%s1629_s4 + $0x18] sm:$0xff] }
 0x128   : > { %1102 = vmatmul.msk.f32.vlgmr.msra.gmra.mxu0 %vm412_vm0, %v449_v44  ;;  %1103 = vmatmul.msk.f32.vlgmr.msra.gmra.mxu2 %vm412_vm0, %v449_v44 }
 0x129   : > { %1105 = vmatmul.msk.f32.vlgmr.msra.gmra.mxu3 %vm412_vm0, %v449_v44 }
 0x130   : > { %1104 = vmatmul.msk.f32.vlgmr.msrb.gmra.mxu2 %vm412_vm0, %v449_v44 }
 0x1a5   : > { %v486_v48 = vpop.f32.mrf.mxu0 }
 0x1ab   : > { %v506_v45 = vpop.f32.mrf.mxu2 }
 0x1ac   : > { %v1461_v46 = vpop.f32.mrf.mxu3  ;;  %578 = vrot.lane.b32.xlu1 %v506_v45, %s1273_s17  ;;  %v1174_v9 = vpack.i.bf16 %v506_v45, %v486_v48 }
 0x1ad   : > { %632 = vrot.lane.b32.xlu2 %v1461_v46, %s1273_s17 }
 0x1b3   : > { %v526_v47 = vpop.f32.mrf.mxu2 }
 0x1b4   : > { %605 = vrot.lane.b32.xlu1 %v526_v47, %s1273_s17  ;;  %v1169_v20 = vpack.i.bf16 %v1461_v46, %v526_v47 }
 0x1b5   : > { %550 = vrot.lane.b32.xlu2 %v486_v48, %s1273_s17  ;;  %s1124_s17 = sshll.u32 %s1361_s25, 3  ;;  %s1022_s25 = scalar_lea.sflag [#allocation3], %s402_s15 }
 0x1b6   : > { %s1032_s20 = scalar_lea.hbm %s1637_s12, %s1124_s17 }
 0x1b7   : > { %s1036_s29 = sshll.u32 %s1032_s20, 4  ;;  %s1037_s29 = int_to_ptr.hbm [resolvable:$true] %s1036_s29 }
 0x1b8   : > { %s1222_s2 = sshra.s32 %s1037_s29, 4  ;;  %s1223_s2 = int_to_ptr.hbm [resolvable:$true] %s1222_s2 }
 0x1b9   : > { %p1229_p0 = scmp.lt.s32.totalorder %s1223_s2, %s1637_s12 }
 0x207   : > { %v633_v49 = vpop.permute.xlu2 %632 }
 0x20f   : > { %v551_v50 = vpop.permute.xlu2 %550 }
 0x210   : > { %1106 = vmatpush.xpose.msk.msrb.mxu0 %vm552_vm5, %v551_v50 }
 0x213   : > { %1107 = vmatmul.msk.f32.vlgmr.msrb.gmra.mxu0 %vm552_vm5, %v486_v48 }
 0x21e   : > { %v579_v51 = vpop.permute.xlu1 %578 }
 0x21f   : > { %1108 = vmatpush.xpose.msk.msrb.mxu3 %vm552_vm5, %v579_v51 }
 0x222   : > { %1109 = vmatmul.msk.f32.vlgmr.msrb.gmra.mxu3 %vm552_vm5, %v506_v45 }
 0x223   : > { %1112 = vmatpush.xpose.msk.msra.mxu3 %vm552_vm5, %v633_v49 }
 0x226   : > { %v606_v52 = vpop.permute.xlu1 %605 }
 0x227   : > { %1110 = vmatpush.xpose.msk.msra.mxu2 %vm552_vm5, %v606_v52 }
 0x22a   : > { %1111 = vmatmul.msk.f32.vlgmr.msra.gmra.mxu2 %vm552_vm5, %v526_v47  ;;  %1113 = vmatmul.msk.f32.vlgmr.msra.gmra.mxu3 %vm552_vm5, %v1461_v46 }
 0x290   : > { %v574_v53 = vpop.f32.mrf.mxu0 }
 0x291   : > { %v658_v54 = vsel %vm552_vm5, %v574_v53, -inf }
 0x292   : > { %659 = vmax.xlane.f32.xlu2 %v658_v54 }
 0x2a5   : > { %v601_v55 = vpop.f32.mrf.mxu3 }
 0x2a6   : > { %v661_v60 = vsel %vm552_vm5, %v601_v55, -inf }
 0x2ad   : > { %v628_v56 = vpop.f32.mrf.mxu2  ;;  %v655_v57 = vpop.f32.mrf.mxu3 }
 0x2ae   : > { %v667_v58 = vsel %vm552_vm5, %v655_v57, -inf  ;;  %v664_v59 = vsel %vm552_vm5, %v628_v56, -inf }
 0x2af   : > { %668 = vmax.xlane.f32.xlu1 %v667_v58  ;;  %665 = vmax.xlane.f32.xlu0 %v664_v59 }
 0x2b7   : > { %662 = vmax.xlane.f32.xlu0 %v661_v60 }
 0x305   : > { %v660_v61 = vpop.xlane.xlu2 %659 }
 0x306   : > { %v670_v62 = vsub.f32 %v574_v53, %v660_v61 }
 0x308   : > { %v674_v63 = vmul.f32 1.442695, %v670_v62 }
 0x30a   : > { %1190 = vpow2.f32 %v674_v63 }
 0x310   : > { %v1191_v1 = vpop.eup %1190 }
 0x311   : > { %v682_v2 = vsel %vm552_vm5, %v1191_v1, 0.0 }
 0x312   : > { %683 = vadd.xlane.f32.xlu2 %v682_v2 }
 0x322   : > { %v666_v3 = vpop.xlane.xlu0 %665  ;;  %v669_v4 = vpop.xlane.xlu1 %668 }
 0x323   : > { %v672_v5 = vsub.f32 %v628_v56, %v666_v3  ;;  %v673_v7 = vsub.f32 %v655_v57, %v669_v4  ;;  %v1181_v56 = vld [vmem:[%s1630_s5] ss:$0 sm:$0xff]  ;;  %v950_v4 = vld [vmem:[%s1633_s8 + $0x18] sm:$0xff] }
 0x325   : > { %v678_v6 = vmul.f32 1.442695, %v672_v5  ;;  %v680_v10 = vmul.f32 1.442695, %v673_v7  ;;  %v948_v5 = vld [vmem:[%s1633_s8 + $0x8] sm:$0xff]  ;;  %v994_v7 = vld [vmem:[%s1635_s10 + $0x78] sm:$0xff] }
 0x327   : > { %1192 = vpow2.f32 %v678_v6  ;;  %v947_v6 = vld [vmem:[%s1633_s8] sm:$0xff] }
 0x328   : > { %1194 = vpow2.f32 %v680_v10  ;;  %v992_v10 = vld [vmem:[%s1635_s10 + $0x68] sm:$0xff] }
 0x32a   : > { %1175 = vrot.lane.b32.xlu2 %v1174_v9, %s1274_s18  ;;  %v663_v11 = vpop.xlane.xlu0 %662  ;;  %v993_v9 = vld [vmem:[%s1635_s10 + $0x70] sm:$0xff] }
 0x32b   : > { %v671_v12 = vsub.f32 %v601_v55, %v663_v11 }
 0x32d   : > { %v1193_v13 = vpop.eup %1192  ;;  %v676_v14 = vmul.f32 1.442695, %v671_v12 }
 0x32e   : > { %v688_v15 = vsel %vm552_vm5, %v1193_v13, 0.0  ;;  %v1195_v16 = vpop.eup %1194 }
 0x32f   : > { %1196 = vpow2.f32 %v676_v14  ;;  %689 = vadd.xlane.f32.xlu0 %v688_v15  ;;  %v691_v19 = vsel %vm552_vm5, %v1195_v16, 0.0  ;;  %v990_v15 = vld [vmem:[%s1635_s10 + $0x58] sm:$0xff] }
 0x335   : > { %v1197_v17 = vpop.eup %1196 }
 0x336   : > { %v685_v18 = vsel %vm552_vm5, %v1197_v17, 0.0 }
 0x337   : > { %686 = vadd.xlane.f32.xlu1 %v685_v18  ;;  %692 = vadd.xlane.f32.xlu0 %v691_v19  ;;  %v986_v19 = vld [vmem:[%s1635_s10 + $0x38] sm:$0xff] }
 0x34b   : > { %1170 = vrot.lane.b32.xlu0 %v1169_v20, %s1274_s18  ;;  %s1224_s18 = scalar_lea.hbm %s1223_s2, 8 }
 0x34c   : > { %p1225_p11 = scmp.ne.s32.totalorder %s1223_s2, %s1224_s18  ;;  %p1230_p1 = scmp.lt.s32.totalorder %s1228_s16, %s1224_s18 }
 0x34e   : > { %p1226_p12 = pnand %p1225_p11, %p1378_p5  ;;  %p1231_p2 = por %p1230_p1, %p1229_p0 }
 0x350   : > { %p1227_p13 = pneg %p1226_p12 }
 0x352   : > { %p1232_p3 = pnand %p1231_p2, %p1227_p13 }
 0x385   : > { %v684_v21 = vpop.xlane.xlu2 %683 }
 0x386   : > { %1198 = vrcp.f32 %v684_v21  ;;  %v985_v21 = vld [vmem:[%s1635_s10 + $0x30] sm:$0xff] }
 0x38c   : > { %v1199_v22 = vpop.eup %1198 }
 0x38d   : > { %v1176_v23 = vpop.permute.xlu2 %1175  ;;  %v698_v26 = vmul.f32 %v1199_v22, %v1191_v1 }
 0x38e   : > { %v1177_v24 = vunpack.i.l.bf16 %v1176_v23  ;;  %v1178_v25 = vunpack.i.h.bf16 %v1176_v23  ;;  %v984_v23 = vld [vmem:[%s1635_s10 + $0x28] sm:$0xff] }
 0x390   : > { %723 = vmatpush.msra.mxu0 %v1177_v24  ;;  %749 = vmatpush.msra.mxu1 %v1178_v25  ;;  %v983_v25 = vld [vmem:[%s1635_s10 + $0x20] sm:$0xff] }
 0x391   : > { %1114 = vmatmul.msk.f32.vlgmr.msra.gmra.mxu0 %vm552_vm5, %v698_v26 }
 0x392   : > { %828 = vmatpush.msrb.mxu0 %v806_v39  ;;  %851 = vmatpush.msrb.mxu1 %v807_v41 }
 0x394   : > { %970 = vmatpush.msra.mxu0 %v950_v4 }
 0x3a2   : > { %v690_v27 = vpop.xlane.xlu0 %689 }
 0x3aa   : > { %v687_v28 = vpop.xlane.xlu1 %686  ;;  %v693_v30 = vpop.xlane.xlu0 %692 }
 0x3ab   : > { %1200 = vrcp.f32 %v687_v28 }
 0x3ac   : > { %1202 = vrcp.f32 %v690_v27  ;;  %v982_v27 = vld [vmem:[%s1635_s10 + $0x18] sm:$0xff] }
 0x3ad   : > { %1204 = vrcp.f32 %v693_v30 }
 0x3b1   : > { %v1201_v29 = vpop.eup %1200 }
 0x3b2   : > { %v699_v31 = vmul.f32 %v1201_v29, %v1197_v17  ;;  %v1203_v32 = vpop.eup %1202  ;;  %v987_v17 = vld [vmem:[%s1635_s10 + $0x40] sm:$0xff] }
 0x3b3   : > { %v1205_v33 = vpop.eup %1204  ;;  %v700_v37 = vmul.f32 %v1203_v32, %v1193_v13  ;;  %v991_v13 = vld [vmem:[%s1635_s10 + $0x60] sm:$0xff] }
 0x3b4   : > { %1115 = vmatmul.msk.f32.vlgmr.msra.gmra.mxu1 %vm552_vm5, %v699_v31  ;;  %v701_v38 = vmul.f32 %v1205_v33, %v1195_v16  ;;  %v989_v16 = vld [vmem:[%s1635_s10 + $0x50] sm:$0xff]  ;;  %v1182_v29 = vld [vmem:[%s1631_s6] ss:$0 sm:$0xff] }
 0x3b5   : > { %999 = vmatpush.msra.mxu1 %v994_v7  ;;  %v1183_v32 = vld [vmem:[%s1632_s7] ss:$0 sm:$0xff] }
 0x3b7   : > { %1000 = vmatpush.msra.mxu1 %v993_v9 }
 0x3b9   : > { %1001 = vmatpush.msra.mxu1 %v992_v10 }
 0x3bb   : > { %1002 = vmatpush.msra.mxu1 %v991_v13 }
 0x3bd   : > { %v1171_v34 = vpop.permute.xlu0 %1170  ;;  %1003 = vmatpush.msra.mxu1 %v990_v15 }
 0x3be   : > { %v1173_v35 = vunpack.i.h.bf16 %v1171_v34  ;;  %v1172_v36 = vunpack.i.l.bf16 %v1171_v34 }
 0x3bf   : > { %1004 = vmatpush.msra.mxu1 %v989_v16 }
 0x3c0   : > { %775 = vmatpush.msrb.mxu2 %v1172_v36  ;;  %801 = vmatpush.msrb.mxu3 %v1173_v35  ;;  %v981_v35 = vld [vmem:[%s1635_s10 + $0x10] sm:$0xff]  ;;  %v980_v36 = vld [vmem:[%s1635_s10 + $0x8] sm:$0xff] }
 0x3c1   : > { %1116 = vmatmul.msk.f32.vlgmr.msrb.gmra.mxu2 %vm552_vm5, %v700_v37  ;;  %1117 = vmatmul.msk.f32.vlgmr.msrb.gmra.mxu3 %vm552_vm5, %v701_v38  ;;  %v979_v37 = vld [vmem:[%s1635_s10] sm:$0xff] }
 0x3c2   : > { %874 = vmatpush.msra.mxu2 %v808_v42  ;;  %897 = vmatpush.msra.mxu3 %v809_v43  ;;  %v1184_v38 = vld [vmem:[%s1634_s9] ss:$0 sm:$0xff] }
 0x3c3   : > { %v1185_v42 = vld [vmem:[%s1636_s11] ss:$0 sm:$0xff] }
 0x40e   : > { %v725_v40 = vpop.f32.mrf.mxu0 }
 0x40f   : > { %1118 = vmatmul.msk.f32.vlgmr.msrb.gmra.mxu0 %vm552_vm5, %v725_v40 }
 0x431   : > { %v751_v44 = vpop.f32.mrf.mxu1 }
 0x432   : > { %1119 = vmatmul.msk.f32.vlgmr.msrb.gmra.mxu1 %vm552_vm5, %v751_v44 }
 0x444   : > { %v777_v45 = vpop.f32.mrf.mxu2  ;;  %v803_v46 = vpop.f32.mrf.mxu3 }
 0x445   : > { %1120 = vmatmul.msk.f32.vlgmr.msra.gmra.mxu2 %vm552_vm5, %v777_v45  ;;  %1121 = vmatmul.msk.f32.vlgmr.msra.gmra.mxu3 %vm552_vm5, %v803_v46 }
 0x48c   : > { %v830_v48 = vpop.f32.mrf.mxu0 }
 0x48d   : > { %v902_v50 = vsel %vm412_vm0, %v830_v48, 0.0 }
 0x4af   : > { %v853_v47 = vpop.f32.mrf.mxu1 }
 0x4b0   : > { %v903_v49 = vsel %vm412_vm0, %v853_v47, 0.0 }
 0x4b1   : > { %v904_v51 = vadd.f32 %v903_v49, %v902_v50 }
 0x4c8   : > { %v876_v52 = vpop.f32.mrf.mxu2  ;;  %v899_v53 = vpop.f32.mrf.mxu3 }
 0x4c9   : > { %v905_v54 = vsel %vm412_vm0, %v876_v52, 0.0  ;;  %v907_v57 = vsel %vm412_vm0, %v899_v53, 0.0 }
 0x4ca   : > { %v906_v55 = vadd.f32 %v905_v54, %v904_v51 }
 0x4cc   : > { %v908_v58 = vadd.f32 %v907_v57, %v906_v55 }
 0x4ce   : > { %v913_v59 = vadd.f32 %v1181_v56, %v908_v58 }
 0x4d0   : > { %v1510_v60 = vadd.f32 %v913_v59, %v1393_v0  ;;  %v949_v0 = vld [vmem:[%s1633_s8 + $0x10] sm:$0xff] }
 0x4d1   : > { %971 = vmatpush.msra.mxu0 %v949_v0 }
 0x4d2   : > { %v917_v61 = vsel %vm412_vm0, %v1510_v60, 0.0 }
 0x4d3   : > { %918 = vadd.xlane.f32.xlu1 %v917_v61  ;;  %972 = vmatpush.msra.mxu0 %v948_v5 }
 0x4d5   : > { %973 = vmatpush.msra.mxu0 %v947_v6 }
 0x546   : > { %v919_v62 = vpop.xlane.xlu1 %918 }
 0x547   : > { %v920_v63 = vmul.f32 %v919_v62, %v1397_v8 }
 0x549   : > { %v921_v1 = vsub.f32 %v1510_v60, %v920_v63 }
 0x54b   : > { %v922_v2 = vmul.f32 %v921_v1, %v921_v1 }
 0x54d   : > { %v923_v3 = vsel %vm412_vm0, %v922_v2, 0.0 }
 0x54e   : > { %924 = vadd.xlane.f32.xlu0 %v923_v3 }
 0x5c1   : > { %v925_v11 = vpop.xlane.xlu0 %924 }
 0x5c2   : > { %v926_v12 = vmul.f32 %v925_v11, %v1397_v8  ;;  %v988_v8 = vld [vmem:[%s1635_s10 + $0x48] sm:$0xff] }
 0x5c3   : > { %1005 = vmatpush.msra.mxu1 %v988_v8 }
 0x5c4   : > { %v927_v14 = vadd.f32 1e-05, %v926_v12 }
 0x5c5   : > { %1006 = vmatpush.msra.mxu1 %v987_v17 }
 0x5c6   : > { %1206 = vrsqrt.f32 %v927_v14  ;;  %vm934_vm7 = vweird.f32 %v927_v14 }
 0x5c7   : > { %1007 = vmatpush.msra.mxu1 %v986_v19 }
 0x5c9   : > { %1008 = vmatpush.msra.mxu1 %v985_v21 }
 0x5cb   : > { %1009 = vmatpush.msra.mxu1 %v984_v23 }
 0x5cc   : > { %v1207_v18 = vpop.eup %1206 }
 0x5cd   : > { %v929_v20 = vmul.f32 %v1207_v18, %v927_v14  ;;  %vm935_vm6 = vweird.f32 %v1207_v18  ;;  %1010 = vmatpush.msra.mxu1 %v983_v25 }
 0x5ce   : > { %vm936_vm8 = vmor %vm934_vm7, %vm935_vm6 }
 0x5cf   : > { %v930_v22 = vmul.f32 %v1207_v18, %v929_v20  ;;  %1011 = vmatpush.msra.mxu1 %v982_v27 }
 0x5d1   : > { %v931_v24 = vmul.f32 0.5, %v930_v22  ;;  %1012 = vmatpush.msra.mxu1 %v981_v35 }
 0x5d3   : > { %v932_v26 = vsub.f32 1.5, %v931_v24  ;;  %1013 = vmatpush.msra.mxu1 %v980_v36 }
 0x5d5   : > { %v933_v28 = vmul.f32 %v1207_v18, %v932_v26  ;;  %1014 = vmatpush.msra.mxu1 %v979_v37 }
 0x5d7   : > { %v937_v30 = vsel %vm936_vm8, %v1207_v18, %v933_v28 }
 0x5d8   : > { %v938_v31 = vmul.f32 %v937_v30, %v921_v1 }
 0x5da   : > { %v942_v33 = vmul.f32 %v1182_v29, %v938_v31 }
 0x5dc   : > { %v946_v34 = vadd.f32 %v1183_v32, %v942_v33 }
 0x5de   : > { %1122 = vmatmul.msk.f32.vlgmr.msra.gmra.mxu0 %vm412_vm0, %v946_v34 }
 0x65b   : > { %v975_v39 = vpop.f32.mrf.mxu0 }
 0x65c   : > { %v976_v40 = vadd.f32 %v1184_v38, %v975_v39 }
 0x65e   : > { %v978_v41 = vmax.f32 %v976_v40, 0.0 }
 0x660   : > { %1015 = vmatmul.f32.vlgmr.msra.gmra.mxu1 %v978_v41 }
 0x6dd   : > { %v1016_v43 = vpop.f32.mrf.mxu1 }
 0x6de   : > { %v1017_v44 = vadd.f32 %v1185_v42, %v1016_v43 }
 0x6e0   : > { %v1019_v45 = vadd.f32 %v1017_v44, %v1510_v60 }
 0x6e2   : > { %1020 = vst.msk [vmem:[%s404_s26] sm:$0xff] %vm412_vm0, %v1019_v45 }
 0x6e3   : > { %1235 = shalt.err (!%p1232_p3)
}
 0x6e4   : > { %1127 = dma.vmem_to_hbm [thread:$0]  (%p1378_p5), %s1035_s28, 128, %s1037_s29, %s1022_s25  }
 0x6e5 PF: > { %p1133_p4 = scmp.ge.s32.totalorder %s1270_s24, 2  ;;  %s1048_s15 = sand.u32 1, %s1258_s21  }
 0x6e6   : > { %s1049_s20 = scalar_lea.sflag [#allocation3], %s1048_s15 }
 0x6e7   : > { %p1130_p7 = pnand %p1133_p4, %p1382_p6 }
 0x6e9   : > { %p1131_p8 = pneg %p1130_p7 }
 0x6eb   : > { %1253 = dma.done.wait (%p1131_p8), %s1049_s20, 128  }
 0x6ec   : > { %1255 = vsyncadd (%p1131_p8), %s1049_s20, 4294967168  ;;  %p22_p9 = scmp.ge.s32.totalorder %s1365_s27, 4   ;;  %s1646_s21 = smov %s1262_s22 }
 0x6ed   : > { %s1647_s22 = smov %s1266_s23  ;;  %s1648_s23 = smov %s1376_s30 }
 0x6ee   : > { %s1649_s24 = smov %s1365_s27  ;;  %24 = sbr.rel (!%p22_p9) target bundleno = 7 (0x7), region = 103 }
 0x6f3   :  { %1055 = vsyncpa [#allocation3], 1 }
 0x6f4   :  { %1057 = vsyncpa [#allocation3 + $0x1], 1 }

</bundles_post_ra>
